<compile_context>
chip_gen: v5e
topology: v5e:2x2
jax: 0.10.0
libtpu: 0.0.40
codegen_flags: <defaults>
</compile_context>

<pallas_src>
import numpy as np
import jax
import jax.numpy as jnp
from jax.experimental import pallas as pl
from jax.experimental.pallas import tpu as pltpu


def _round_up(x, m):
    return ((x + m - 1) // m) * m


def _vmem_capacity_bytes():
    """Physical VMEM per core; conservative (v7x) fallback if unqueryable."""
    try:
        info = pltpu.get_tpu_info()
        cap = getattr(info, "vmem_capacity_bytes", None)
        if cap:
            return int(cap)
    except Exception:
        pass
    return 64 * 1024 * 1024


def _divisor_tiles(n_p, max_tile=1024):
    """Tile sizes (multiples of 128) that evenly divide n_p, ascending."""
    units = n_p // 128
    return [t * 128 for t in range(1, min(units, max_tile // 128) + 1)
            if units % t == 0]


def _make_adj_kernel(resident_xw, tk):
    """out[i-block, :] += adj[i-block, k-block] @ xw[k-block, :]."""

    def kernel(adj_ref, xw_ref, o_ref):
        k = pl.program_id(1)

        @pl.when(k == 0)
        def _init():
            o_ref[...] = jnp.zeros_like(o_ref)

        if resident_xw:
            # Full xw lives in VMEM; slice the reduction block in-kernel.
            start = pl.multiple_of(k * tk, tk)
            xw_blk = xw_ref[pl.ds(start, tk), :]
        else:
            xw_blk = xw_ref[...]

        o_ref[...] += jnp.dot(adj_ref[...], xw_blk,
                              preferred_element_type=jnp.float32)

    return kernel


def fagc_forward(inputs, weight, adj, *, use_bf16=False, max_tile=1024):
    n, input_dim = inputs.shape
    output_dim = weight.shape[1]

    compute_dtype = jnp.bfloat16 if use_bf16 else jnp.float32
    in_bytes = jnp.dtype(compute_dtype).itemsize

    # ---- stage 1: xw = inputs @ weight (tiny matmul -> plain XLA) ----------
    xw = jnp.dot(inputs.astype(jnp.float32), weight.astype(jnp.float32),
                 preferred_element_type=jnp.float32)

    # ---- padding: nearest 128 only; zeros do not change the product --------
    n_p = _round_up(n, 128)
    d_p = _round_up(output_dim, 128)

    xw_p = xw.astype(compute_dtype)
    if (n_p, d_p) != (n, output_dim):
        xw_p = jnp.pad(xw_p, ((0, n_p - n), (0, d_p - output_dim)))

    adj_p = adj.astype(compute_dtype)
    if n_p != n:  # skip the extra HBM pass over adj when already aligned
        adj_p = jnp.pad(adj_p, ((0, n_p - n), (0, n_p - n)))

    # ---- per-generation VMEM budget ----------------------------------------
    vmem_cap = _vmem_capacity_bytes()
    vmem_limit = min(max(int(vmem_cap * 0.45), 32 * 1024 * 1024),
                     64 * 1024 * 1024)
    budget = vmem_limit - 4 * 1024 * 1024  # headroom for pipeline scratch

    # ---- tile selection -----------------------------------------------------
    cands = _divisor_tiles(n_p, max_tile)
    tm_cands = [t for t in cands if n_p // t >= 2] or cands  # >=2 row blocks (v7x)
    tm = tm_cands[-1]
    tk = cands[-1]

    def vmem_need(tm_, tk_, resident):
        adj_bufs = 2 * tm_ * tk_ * in_bytes              # double-buffered adj
        out_bufs = 2 * tm_ * d_p * 4                     # f32 output block
        xw_bufs = (2 * n_p * d_p * in_bytes) if resident else (2 * tk_ * d_p * in_bytes)
        return adj_bufs + out_bufs + xw_bufs

    # Shrink tiles (next-smaller divisor) until the streaming working set fits.
    while vmem_need(tm, tk, False) > budget:
        smaller_tk = [t for t in cands if t < tk]
        smaller_tm = [t for t in cands if t < tm]
        if tk >= tm and smaller_tk:
            tk = smaller_tk[-1]
        elif smaller_tm:
            tm = smaller_tm[-1]
        elif smaller_tk:
            tk = smaller_tk[-1]
        else:
            break

    resident_xw = vmem_need(tm, tk, True) <= budget

    if resident_xw:
        xw_spec = pl.BlockSpec((n_p, d_p), lambda i, k: (0, 0))  # DMA'd once
    else:
        xw_spec = pl.BlockSpec((tk, d_p), lambda i, k: (k, 0))   # streamed

    xw_hbm_reads = 1 if resident_xw else (n_p // tm)
    bytes_accessed = (n_p * n_p * in_bytes                       # adj once
                      + xw_hbm_reads * n_p * d_p * in_bytes      # xw
                      + n_p * d_p * 4)                           # out written once

    # ---- stage 2: out = adj @ xw (dominant, HBM-bound matmul) --------------
    out_p = pl.pallas_call(
        _make_adj_kernel(resident_xw, tk),
        out_shape=jax.ShapeDtypeStruct((n_p, d_p), jnp.float32),
        grid_spec=pltpu.PrefetchScalarGridSpec(
            num_scalar_prefetch=0,
            grid=(n_p // tm, n_p // tk),
            in_specs=[
                pl.BlockSpec((tm, tk), lambda i, k: (i, k)),
                xw_spec,
            ],
            out_specs=pl.BlockSpec((tm, d_p), lambda i, k: (i, 0)),
        ),
        compiler_params=pltpu.CompilerParams(
            dimension_semantics=("parallel", "arbitrary"),
            vmem_limit_bytes=vmem_limit,
        ),
        cost_estimate=pl.CostEstimate(
            flops=2 * n_p * n_p * d_p,
            transcendentals=0,
            bytes_accessed=bytes_accessed,
        ),
    )(adj_p, xw_p)

    # Slice the zero-padded rows/columns back off.
    return out_p[:n, :output_dim]


def glorot_init(key, input_dim, output_dim):
    # mirrors torch glorot_init: uniform(-r, r), r = sqrt(6/(in+out))
    init_range = np.sqrt(6.0 / (input_dim + output_dim))
    return jax.random.uniform(
        key, (input_dim, output_dim), dtype=jnp.float32,
        minval=-init_range, maxval=init_range)


if __name__ == "__main__":
    # small shapes consistent with the module: n nodes, feature dims
    N, INPUT_DIM, OUTPUT_DIM = 8, 32, 16

    key = jax.random.PRNGKey(0)
    k_w, k_x, k_adj = jax.random.split(key, 3)

    weight = glorot_init(k_w, INPUT_DIM, OUTPUT_DIM)
    inputs = jax.random.normal(k_x, (N, INPUT_DIM), dtype=jnp.float32)
    adj = jax.random.normal(k_adj, (N, N), dtype=jnp.float32)

    out = fagc_forward(inputs, weight, adj)
    out = jax.block_until_ready(out)

    # correctness check vs pure-JAX reference
    ref = adj @ (inputs @ weight)
    np.testing.assert_allclose(np.asarray(out), np.asarray(ref),
                               rtol=1e-5, atol=1e-5)

    print("KERNEL_OK")
</pallas_src>

<mosaic_0001>
module attributes {stable_mosaic.version = 11 : i64} {
  func.func @kernel(%arg0: i32, %arg1: i32, %arg2: memref<128x128xf32, #tpu.memory_space<vmem>>, %arg3: memref<128x128xf32, #tpu.memory_space<vmem>>, %arg4: memref<128x128xf32, #tpu.memory_space<vmem>>) attributes {dimension_semantics = [#tpu.dimension_semantics<parallel>, #tpu.dimension_semantics<arbitrary>], iteration_bounds = array<i64: 1, 1>, scalar_prefetch = 0 : i64, scratch_operands = 0 : i64, tpu.core_type = #tpu.core_type<tc>, window_params = [{transform_indices = @transform_0, window_bounds = array<i64: 128, 128>}, {pipeline_mode = #tpu.pipeline_mode<synchronous>, transform_indices = @transform_1, window_bounds = array<i64: 128, 128>}, {transform_indices = @transform_2, window_bounds = array<i64: 128, 128>}]} {
    %c0_i32 = arith.constant 0 : i32
    %0 = arith.cmpi eq, %arg1, %c0_i32 : i32
    %1 = arith.extui %0 : i1 to i32
    %c0_i32_0 = arith.constant 0 : i32
    %2 = arith.cmpi ne, %1, %c0_i32_0 : i32
    scf.if %2 {
      %cst_7 = arith.constant 0.000000e+00 : f32
      %12 = vector.broadcast %cst_7 : f32 to vector<128x128xf32>
      %c0_8 = arith.constant 0 : index
      %c0_9 = arith.constant 0 : index
      %13 = vector.load %arg4[%c0_8, %c0_9] : memref<128x128xf32, #tpu.memory_space<vmem>>, vector<128x128xf32>
      tpu.vector_store %arg4[%c0_8, %c0_9], %12 {strides = array<i32>} : memref<128x128xf32, #tpu.memory_space<vmem>>, vector<128x128xf32>,
    } else {
    }
    %c128_i32 = arith.constant 128 : i32
    %3 = arith.muli %arg1, %c128_i32 : i32
    %4 = tpu.assume_multiple %3, 128 : i32
    %5 = arith.index_cast %4 : i32 to index
    %c0 = arith.constant 0 : index
    %6 = vector.load %arg3[%5, %c0] : memref<128x128xf32, #tpu.memory_space<vmem>>, vector<128x128xf32>
    %c0_1 = arith.constant 0 : index
    %c0_2 = arith.constant 0 : index
    %7 = vector.load %arg4[%c0_1, %c0_2] : memref<128x128xf32, #tpu.memory_space<vmem>>, vector<128x128xf32>
    %c0_3 = arith.constant 0 : index
    %c0_4 = arith.constant 0 : index
    %8 = vector.load %arg2[%c0_3, %c0_4] : memref<128x128xf32, #tpu.memory_space<vmem>>, vector<128x128xf32>
    %cst = arith.constant dense<0.000000e+00> : vector<128x128xf32>
    %9 = tpu.matmul %8, %6, %cst {dimension_numbers = #tpu.dot_dimension_numbers<[1], [0], [0], [1], [0, 0, 1, 1], [], []>} : vector<128x128xf32>, vector<128x128xf32>, vector<128x128xf32> -> vector<128x128xf32>
    %10 = arith.addf %7, %9 : vector<128x128xf32>
    %c0_5 = arith.constant 0 : index
    %c0_6 = arith.constant 0 : index
    %11 = vector.load %arg4[%c0_5, %c0_6] : memref<128x128xf32, #tpu.memory_space<vmem>>, vector<128x128xf32>
    tpu.vector_store %arg4[%c0_5, %c0_6], %10 {strides = array<i32>} : memref<128x128xf32, #tpu.memory_space<vmem>>, vector<128x128xf32>,
    return
  }
  func.func @transform_0(%arg0: i32, %arg1: i32) -> (i32, i32) {
    %c0_i32 = arith.constant 0 : i32
    return %arg0, %arg1 : i32, i32
  }
  func.func @transform_1(%arg0: i32, %arg1: i32) -> (i32, i32) {
    %c0_i32 = arith.constant 0 : i32
    %c0_i32_0 = arith.constant 0 : i32
    %c0_i32_1 = arith.constant 0 : i32
    return %c0_i32, %c0_i32_0 : i32, i32
  }
  func.func @transform_2(%arg0: i32, %arg1: i32) -> (i32, i32) {
    %c0_i32 = arith.constant 0 : i32
    %c0_i32_0 = arith.constant 0 : i32
    return %arg0, %c0_i32 : i32, i32
  }
}

</mosaic_0001>

<bundles_post_ra>
// kernel: tpu_custom_call.1
= control target key start
LH: loop header
LB: loop body
LE: loop exit
PB: predicated region body
PF: predicated region fallthrough
CT: control target
= control target key end

     0   :  { %7 = vsyncpa [#allocation3], 0  ;;  %s401_s0 = inlined_call_operand.hbm [shape: f32[128,128], index: 0, kind: input, shape index: {}]   ;;  %s402_s1 = inlined_call_operand.hbm [shape: f32[128,128], index: 1, kind: input, shape index: {}]   ;;  %s403_s2 = inlined_call_operand.hbm [shape: f32[128,128], index: 2, kind: output, shape index: {}]  }
   0x1   :  { %8 = vsyncpa [#allocation6], 0 }
   0x2   :  { %9 = vsyncpa [#allocation4], 0  ;;  %s14_s11 = sshll.u32 %s401_s0, 4  ;;  %s363_s12 = smov [#allocation2]   ;;  %s15_s11 = int_to_ptr.hbm [resolvable:$true] %s14_s11 }
   0x3   :  { %s16_s13 = sshll.u32 %s363_s12, 4  ;;  %s27_s16 = sshll.u32 %s402_s1, 4  ;;  %s17_s13 = int_to_ptr.vmem [resolvable:$true] %s16_s13  ;;  %s28_s16 = int_to_ptr.hbm [resolvable:$true] %s27_s16 }
   0x4   :  { %s364_s17 = smov 128   ;;  %s365_s18 = smov 8  }
   0x5   :  { %22 = dma.hbm_to_vmem [thread:$0]  %s15_s11, 2048, %s17_s13, [#allocation3], %s364_s17, %s364_s17, %s365_s18  }
   0x6   :  { %s366_s19 = smov [#allocation5]  }
   0x7   :  { %s29_s20 = sshll.u32 %s366_s19, 4  ;;  %s30_s20 = int_to_ptr.vmem [resolvable:$true] %s29_s20 }
   0x8   :  { %35 = dma.hbm_to_vmem [thread:$0]  %s28_s16, 2048, %s30_s20, [#allocation6], %s364_s17, %s364_s17, %s365_s18  }
   0x9   :  { %357 = dma.done.wait [#allocation3], 2048  }
   0xa   :  { %358 = vsyncadd [#allocation3], 4294965248 }
   0xb   :  { %359 = dma.done.wait [#allocation6], 2048  }
   0xc   :  { %360 = vsyncadd [#allocation6], 4294965248  ;;  %v81_v0 = vld [vmem:[#allocation5 + $0x78] sm:$0xff]  ;;  %v80_v1 = vld [vmem:[#allocation5 + $0x70] sm:$0xff]  ;;  %s367_s0 = smov [#allocation7]   ;;  %s217_s23 = sshll.u32 %s403_s2, 4  ;;  %s218_s23 = int_to_ptr.hbm [resolvable:$true] %s217_s23 }
   0xd   :  { %232 = vmatpush.msra.mxu2 %v81_v0  ;;  %233 = vmatpush.msra.mxu3 %v81_v0  ;;  %v79_v2 = vld [vmem:[#allocation5 + $0x68] sm:$0xff]  ;;  %v78_v3 = vld [vmem:[#allocation5 + $0x60] sm:$0xff]  ;;  %v77_v4 = vld [vmem:[#allocation5 + $0x58] sm:$0xff]  ;;  %s215_s1 = sshll.u32 %s367_s0, 4  ;;  %s216_s1 = int_to_ptr.vmem [resolvable:$true] %s215_s1 }
   0xe   :  { %114 = vmatpush.msra.mxu0 %v81_v0  ;;  %231 = vmatpush.msra.mxu1 %v81_v0  ;;  %v76_v5 = vld [vmem:[#allocation5 + $0x50] sm:$0xff]  ;;  %v75_v6 = vld [vmem:[#allocation5 + $0x48] sm:$0xff]  ;;  %v74_v7 = vld [vmem:[#allocation5 + $0x40] sm:$0xff] }
   0xf   :  { %235 = vmatpush.msra.mxu2 %v80_v1  ;;  %236 = vmatpush.msra.mxu3 %v80_v1  ;;  %v73_v8 = vld [vmem:[#allocation5 + $0x38] sm:$0xff]  ;;  %v72_v9 = vld [vmem:[#allocation5 + $0x30] sm:$0xff]  ;;  %v71_v10 = vld [vmem:[#allocation5 + $0x28] sm:$0xff] }
  0x10   :  { %115 = vmatpush.msra.mxu0 %v80_v1  ;;  %234 = vmatpush.msra.mxu1 %v80_v1  ;;  %v70_v11 = vld [vmem:[#allocation5 + $0x20] sm:$0xff]  ;;  %v69_v12 = vld [vmem:[#allocation5 + $0x18] sm:$0xff]  ;;  %v68_v13 = vld [vmem:[#allocation5 + $0x10] sm:$0xff] }
  0x11   :  { %238 = vmatpush.msra.mxu2 %v79_v2  ;;  %239 = vmatpush.msra.mxu3 %v79_v2  ;;  %v67_v14 = vld [vmem:[#allocation5 + $0x8] sm:$0xff]  ;;  %v66_v15 = vld [vmem:[#allocation5] sm:$0xff]  ;;  %v108_v24 = vld [vmem:[#allocation2 + $0x50] sm:$0xff] }
  0x12   :  { %116 = vmatpush.msra.mxu0 %v79_v2  ;;  %237 = vmatpush.msra.mxu1 %v79_v2  ;;  %v106_v16 = vld [vmem:[#allocation2 + $0x40] sm:$0xff]  ;;  %v107_v20 = vld [vmem:[#allocation2 + $0x48] sm:$0xff]  ;;  %v112_v25 = vld [vmem:[#allocation2 + $0x70] sm:$0xff] }
  0x13   :  { %241 = vmatpush.msra.mxu2 %v78_v3  ;;  %242 = vmatpush.msra.mxu3 %v78_v3  ;;  %v110_v17 = vld [vmem:[#allocation2 + $0x60] sm:$0xff]  ;;  %v111_v21 = vld [vmem:[#allocation2 + $0x68] sm:$0xff]  ;;  %v100_v26 = vld [vmem:[#allocation2 + $0x10] sm:$0xff] }
  0x14   :  { %117 = vmatpush.msra.mxu0 %v78_v3  ;;  %240 = vmatpush.msra.mxu1 %v78_v3  ;;  %v98_v18 = vld [vmem:[#allocation2] sm:$0xff]  ;;  %v99_v22 = vld [vmem:[#allocation2 + $0x8] sm:$0xff]  ;;  %v104_v27 = vld [vmem:[#allocation2 + $0x30] sm:$0xff] }
  0x15   :  { %244 = vmatpush.msra.mxu2 %v77_v4  ;;  %245 = vmatpush.msra.mxu3 %v77_v4  ;;  %v102_v19 = vld [vmem:[#allocation2 + $0x20] sm:$0xff]  ;;  %v103_v23 = vld [vmem:[#allocation2 + $0x28] sm:$0xff]  ;;  %v109_v28 = vld [vmem:[#allocation2 + $0x58] sm:$0xff] }
  0x16   :  { %118 = vmatpush.msra.mxu0 %v77_v4  ;;  %243 = vmatpush.msra.mxu1 %v77_v4  ;;  %v113_v29 = vld [vmem:[#allocation2 + $0x78] sm:$0xff] }
  0x17   :  { %247 = vmatpush.msra.mxu2 %v76_v5  ;;  %248 = vmatpush.msra.mxu3 %v76_v5  ;;  %v101_v30 = vld [vmem:[#allocation2 + $0x18] sm:$0xff] }
  0x18   :  { %119 = vmatpush.msra.mxu0 %v76_v5  ;;  %246 = vmatpush.msra.mxu1 %v76_v5  ;;  %v105_v31 = vld [vmem:[#allocation2 + $0x38] sm:$0xff] }
  0x19   :  { %250 = vmatpush.msra.mxu2 %v75_v6  ;;  %251 = vmatpush.msra.mxu3 %v75_v6 }
  0x1a   :  { %120 = vmatpush.msra.mxu0 %v75_v6  ;;  %249 = vmatpush.msra.mxu1 %v75_v6 }
  0x1b   :  { %253 = vmatpush.msra.mxu2 %v74_v7  ;;  %254 = vmatpush.msra.mxu3 %v74_v7 }
  0x1c   :  { %121 = vmatpush.msra.mxu0 %v74_v7  ;;  %252 = vmatpush.msra.mxu1 %v74_v7 }
  0x1d   :  { %256 = vmatpush.msra.mxu2 %v73_v8  ;;  %257 = vmatpush.msra.mxu3 %v73_v8 }
  0x1e   :  { %122 = vmatpush.msra.mxu0 %v73_v8  ;;  %255 = vmatpush.msra.mxu1 %v73_v8 }
  0x1f   :  { %259 = vmatpush.msra.mxu2 %v72_v9  ;;  %260 = vmatpush.msra.mxu3 %v72_v9 }
  0x20   :  { %123 = vmatpush.msra.mxu0 %v72_v9  ;;  %258 = vmatpush.msra.mxu1 %v72_v9 }
  0x21   :  { %262 = vmatpush.msra.mxu2 %v71_v10  ;;  %263 = vmatpush.msra.mxu3 %v71_v10 }
  0x22   :  { %124 = vmatpush.msra.mxu0 %v71_v10  ;;  %261 = vmatpush.msra.mxu1 %v71_v10 }
  0x23   :  { %265 = vmatpush.msra.mxu2 %v70_v11  ;;  %266 = vmatpush.msra.mxu3 %v70_v11 }
  0x24   :  { %125 = vmatpush.msra.mxu0 %v70_v11  ;;  %264 = vmatpush.msra.mxu1 %v70_v11 }
  0x25   :  { %268 = vmatpush.msra.mxu2 %v69_v12  ;;  %269 = vmatpush.msra.mxu3 %v69_v12 }
  0x26   :  { %126 = vmatpush.msra.mxu0 %v69_v12  ;;  %267 = vmatpush.msra.mxu1 %v69_v12 }
  0x27   :  { %271 = vmatpush.msra.mxu2 %v68_v13  ;;  %272 = vmatpush.msra.mxu3 %v68_v13 }
  0x28   :  { %127 = vmatpush.msra.mxu0 %v68_v13  ;;  %270 = vmatpush.msra.mxu1 %v68_v13 }
  0x29   :  { %274 = vmatpush.msra.mxu2 %v67_v14  ;;  %275 = vmatpush.msra.mxu3 %v67_v14 }
  0x2a   :  { %128 = vmatpush.msra.mxu0 %v67_v14  ;;  %273 = vmatpush.msra.mxu1 %v67_v14 }
  0x2b   :  { %277 = vmatpush.msra.mxu2 %v66_v15  ;;  %278 = vmatpush.msra.mxu3 %v66_v15 }
  0x2c   :  { %154 = vmatmul.f32.vlgmr.msra.gmra.mxu2 %v106_v16  ;;  %166 = vmatmul.f32.vlgmr.msra.gmra.mxu3 %v110_v17 }
  0x2d   :  { %129 = vmatpush.msra.mxu0 %v66_v15  ;;  %276 = vmatpush.msra.mxu1 %v66_v15 }
  0x2e   :  { %130 = vmatmul.f32.vlgmr.msra.gmra.mxu0 %v98_v18  ;;  %142 = vmatmul.f32.vlgmr.msra.gmra.mxu1 %v102_v19 }
  0x34   :  { %157 = vmatmul.f32.gmra.mxu2 %v107_v20  ;;  %169 = vmatmul.f32.gmra.mxu3 %v111_v21 }
  0x36   :  { %133 = vmatmul.f32.gmra.mxu0 %v99_v22  ;;  %145 = vmatmul.f32.gmra.mxu1 %v103_v23 }
  0x3c   :  { %160 = vmatmul.f32.gmra.mxu2 %v108_v24  ;;  %172 = vmatmul.f32.gmra.mxu3 %v112_v25 }
  0x3e   :  { %136 = vmatmul.f32.gmra.mxu0 %v100_v26  ;;  %148 = vmatmul.f32.gmra.mxu1 %v104_v27 }
  0x44   :  { %163 = vmatmul.f32.gmra.mxu2 %v109_v28  ;;  %175 = vmatmul.f32.gmra.mxu3 %v113_v29 }
  0x46   :  { %139 = vmatmul.f32.gmra.mxu0 %v101_v30  ;;  %151 = vmatmul.f32.gmra.mxu1 %v105_v31 }
  0xab   :  { %v131_v32 = vpop.f32.mrf.mxu0  ;;  %v143_v33 = vpop.f32.mrf.mxu1 }
  0xac   :  { %195 = vst [vmem:[#allocation7] sm:$0xff] %v131_v32 }
  0xad   :  { %199 = vst [vmem:[#allocation7 + $0x20] sm:$0xff] %v143_v33 }
  0xaf   :  { %v155_v34 = vpop.f32.mrf.mxu2  ;;  %v167_v35 = vpop.f32.mrf.mxu3 }
  0xb0   :  { %203 = vst [vmem:[#allocation7 + $0x40] sm:$0xff] %v155_v34 }
  0xb1   :  { %207 = vst [vmem:[#allocation7 + $0x60] sm:$0xff] %v167_v35 }
  0xb3   :  { %v134_v36 = vpop.f32.mrf.mxu0  ;;  %v146_v37 = vpop.f32.mrf.mxu1 }
  0xb4   :  { %196 = vst [vmem:[#allocation7 + $0x8] sm:$0xff] %v134_v36 }
  0xb5   :  { %200 = vst [vmem:[#allocation7 + $0x28] sm:$0xff] %v146_v37 }
  0xb7   :  { %v158_v38 = vpop.f32.mrf.mxu2  ;;  %v170_v39 = vpop.f32.mrf.mxu3 }
  0xb8   :  { %204 = vst [vmem:[#allocation7 + $0x48] sm:$0xff] %v158_v38 }
  0xb9   :  { %208 = vst [vmem:[#allocation7 + $0x68] sm:$0xff] %v170_v39 }
  0xbb   :  { %v137_v40 = vpop.f32.mrf.mxu0  ;;  %v149_v41 = vpop.f32.mrf.mxu1 }
  0xbc   :  { %197 = vst [vmem:[#allocation7 + $0x10] sm:$0xff] %v137_v40 }
  0xbd   :  { %201 = vst [vmem:[#allocation7 + $0x30] sm:$0xff] %v149_v41 }
  0xbf   :  { %v161_v42 = vpop.f32.mrf.mxu2  ;;  %v173_v43 = vpop.f32.mrf.mxu3 }
  0xc0   :  { %205 = vst [vmem:[#allocation7 + $0x50] sm:$0xff] %v161_v42 }
  0xc1   :  { %209 = vst [vmem:[#allocation7 + $0x70] sm:$0xff] %v173_v43 }
  0xc3   :  { %v140_v44 = vpop.f32.mrf.mxu0  ;;  %v152_v45 = vpop.f32.mrf.mxu1 }
  0xc4   :  { %198 = vst [vmem:[#allocation7 + $0x18] sm:$0xff] %v140_v44 }
  0xc5   :  { %202 = vst [vmem:[#allocation7 + $0x38] sm:$0xff] %v152_v45 }
  0xc7   :  { %v164_v46 = vpop.f32.mrf.mxu2  ;;  %v176_v47 = vpop.f32.mrf.mxu3 }
  0xc8   :  { %206 = vst [vmem:[#allocation7 + $0x58] sm:$0xff] %v164_v46 }
  0xc9   :  { %210 = vst [vmem:[#allocation7 + $0x78] sm:$0xff] %v176_v47 }
  0xca   :  { %223 = dma.vmem_to_hbm [thread:$0]  %s216_s1, 2048, %s218_s23, [#allocation4], %s364_s17, %s364_s17, %s365_s18  }
  0xcb   :  { %361 = dma.done.wait [#allocation4], 2048  }
  0xcc   :  { %362 = vsyncadd [#allocation4], 4294965248 }
  0xcd   :  { %228 = vsyncpa [#allocation3], 1 }
  0xce   :  { %229 = vsyncpa [#allocation6], 1 }
  0xcf   :  { %230 = vsyncpa [#allocation4], 1 }

</bundles_post_ra>
